<compile_context>
chip_gen: v7x
topology: tpu7x:2x2x1
jax: 0.10.0
libtpu: 0.0.40
codegen_flags: <defaults>
</compile_context>

<pallas_src>
import jax
import jax.numpy as jnp
from jax.experimental import pallas as pl
from jax.experimental.pallas import tpu as pltpu


def _cdiv(a, b):
    return -(-a // b)


def _round_up(v, m):
    return ((v + m - 1) // m) * m


def _hswish_ref(x):
    xf = x.astype(jnp.float32)
    return (xf * jnp.clip(xf + 3.0, 0.0, 6.0) * (1.0 / 6.0)).astype(x.dtype)


def _hswish_kernel(x_ref, o_ref):
    x = x_ref[...].astype(jnp.float32)
    r6 = jnp.clip(x + 3.0, 0.0, 6.0)              # relu6(x + 3)
    o_ref[...] = (x * r6 * (1.0 / 6.0)).astype(o_ref.dtype)


def _tpu_budget():
    """(target_block_bytes, vmem_limit_bytes or None), per TPU generation."""
    kind = ""
    try:
        kind = jax.devices()[0].device_kind.lower()
    except Exception:
        pass
    if "v7" in kind or "tpu7" in kind:
        # v7x: 64 MiB physical / 32 MiB scoped default.  8 MiB blocks (4x
        # double-buffered = 32 MiB) need a raised limit; 48 MiB leaves headroom.
        return 8 << 20, 48 << 20
    if "v6" in kind:
        # 32 MiB scoped default: 4 MiB blocks (4x = 16 MiB), no override needed.
        return 4 << 20, None
    # v5e (16 MiB scoped default) and anything unrecognized: 2 MiB blocks
    # (4x = 8 MiB) — do NOT blindly reuse the bigger v6e/v7x blocks here.
    return 2 << 20, None


def _pick_cols(n, max_lane=2048):
    """Largest multiple of 128 (<= max_lane) dividing n, else 0."""
    for k in range(max_lane // 128, 0, -1):
        c = 128 * k
        if n % c == 0:
            return c
    return 0


def _pick_tile_rows(rows, cols, itemsize, target_block_bytes):
    """Row-block size: big blocks for DMA efficiency, but always an even grid
    of >= 2 steps once there is >= ~1 MiB of work (v7x megacore sharding)."""
    total_bytes = rows * cols * itemsize
    target_rows = max(32, (target_block_bytes // (cols * itemsize)) // 32 * 32)
    if rows <= target_rows:
        if total_bytes >= (1 << 20) and rows >= 16:
            tile_rows = _round_up(_cdiv(rows, 2), 32)   # 2 balanced steps
        else:
            tile_rows = rows                            # single block
    else:
        g = _cdiv(rows, target_rows)
        if g % 2:                                       # avoid a lone odd tail
            g += 1
        tile_rows = max(32, _round_up(_cdiv(rows, g), 32))
    return min(tile_rows, rows) if tile_rows >= rows else tile_rows


def _hswish_2d(x2d, tile_rows, vmem_limit_bytes, donate_input):
    rows, cols = x2d.shape
    n = x2d.size
    itemsize = jnp.dtype(x2d.dtype).itemsize
    return pl.pallas_call(
        _hswish_kernel,
        out_shape=jax.ShapeDtypeStruct((rows, cols), x2d.dtype),
        grid_spec=pltpu.PrefetchScalarGridSpec(
            num_scalar_prefetch=0,
            grid=(pl.cdiv(rows, tile_rows),),
            in_specs=[pl.BlockSpec((tile_rows, cols), lambda i: (i, 0))],
            out_specs=pl.BlockSpec((tile_rows, cols), lambda i: (i, 0)),
        ),
        compiler_params=pltpu.CompilerParams(
            dimension_semantics=("parallel",),
            vmem_limit_bytes=vmem_limit_bytes,
        ),
        cost_estimate=pl.CostEstimate(
            flops=5 * n,                      # add + 2 clamps + 2 muls per elem
            transcendentals=0,
            bytes_accessed=2 * n * itemsize,
        ),
        input_output_aliases={0: 0} if donate_input else {},
    )(x2d)


def h_swish(x, *, donate_input=False):
    """Elementwise h-swish matching PyTorch: x * relu6(x + 3) / 6."""
    orig_shape = x.shape
    n = x.size
    if n == 0:
        return x
    itemsize = jnp.dtype(x.dtype).itemsize
    target_block_bytes, vmem_limit_bytes = _tpu_budget()

    def run_aligned(arr, count):
        cols = _pick_cols(count)
        x2d = arr.reshape(count // cols, cols)
        tile_rows = _pick_tile_rows(x2d.shape[0], cols, itemsize,
                                    target_block_bytes)
        return _hswish_2d(x2d, tile_rows, vmem_limit_bytes, donate_input)

    if _pick_cols(n):
        # Common case (n % 128 == 0): zero-copy collapsing reshape to a
        # lane-dense slab, single Pallas call, no pad/slice traffic.
        return run_aligned(x, n).reshape(orig_shape)

    # Rare unaligned tail: Pallas on the 128-aligned prefix, plain JAX on the
    # <128-element remainder, one concatenate to stitch.
    flat = x.reshape(-1)
    n_main = (n // 128) * 128
    if n_main == 0:
        return _hswish_ref(x)                 # tiny input: not worth a kernel
    head_out = run_aligned(flat[:n_main], n_main).reshape(-1)
    tail_out = _hswish_ref(flat[n_main:])
    return jnp.concatenate([head_out, tail_out]).reshape(orig_shape)


if __name__ == "__main__":
    key = jax.random.PRNGKey(0)

    # NCHW input like the PyTorch module: batch=2, channels=4, H=W=16
    x = jax.random.normal(key, (2, 4, 16, 16), dtype=jnp.float32) * 3.0
    out = jax.block_until_ready(h_swish(x))
    ref = x * jnp.clip(x + 3.0, 0.0, 6.0) / 6.0
    assert out.shape == x.shape and out.dtype == x.dtype
    assert jnp.allclose(out, ref, atol=1e-5, rtol=1e-6)

    # Exercise the unaligned-tail path (500 elements: 384 via Pallas + 116 JAX).
    y = jax.random.normal(jax.random.PRNGKey(1), (5, 100), dtype=jnp.float32) * 3.0
    out_y = jax.block_until_ready(h_swish(y))
    ref_y = y * jnp.clip(y + 3.0, 0.0, 6.0) / 6.0
    assert out_y.shape == y.shape and jnp.allclose(out_y, ref_y, atol=1e-5, rtol=1e-6)

    print("KERNEL_OK")
</pallas_src>

<mosaic_0001>
module attributes {stable_mosaic.version = 11 : i64} {
  func.func @_hswish_kernel(%arg0: i32, %arg1: memref<1x2048xf32, #tpu.memory_space<vmem>>, %arg2: memref<1x2048xf32, #tpu.memory_space<vmem>>) attributes {dimension_semantics = [#tpu.dimension_semantics<parallel>], iteration_bounds = array<i64: 1>, scalar_prefetch = 0 : i64, scratch_operands = 0 : i64, tpu.core_type = #tpu.core_type<tc>, window_params = [{transform_indices = @transform_0, window_bounds = array<i64: 1, 2048>}, {transform_indices = @transform_1, window_bounds = array<i64: 1, 2048>}]} {
    %c0 = arith.constant 0 : index
    %c0_0 = arith.constant 0 : index
    %0 = vector.load %arg1[%c0, %c0_0] : memref<1x2048xf32, #tpu.memory_space<vmem>>, vector<1x2048xf32>
    %cst = arith.constant 3.000000e+00 : f32
    %1 = vector.broadcast %cst : f32 to vector<1x2048xf32>
    %2 = arith.addf %0, %1 : vector<1x2048xf32>
    %cst_1 = arith.constant 0.000000e+00 : f32
    %cst_2 = arith.constant 6.000000e+00 : f32
    %3 = vector.broadcast %cst_1 : f32 to vector<1x2048xf32>
    %4 = arith.maximumf %3, %2 : vector<1x2048xf32>
    %5 = vector.broadcast %cst_2 : f32 to vector<1x2048xf32>
    %6 = arith.minimumf %5, %4 : vector<1x2048xf32>
    %7 = arith.mulf %0, %6 : vector<1x2048xf32>
    %cst_3 = arith.constant 0.166666672 : f32
    %8 = vector.broadcast %cst_3 : f32 to vector<1x2048xf32>
    %9 = arith.mulf %7, %8 : vector<1x2048xf32>
    %c0_4 = arith.constant 0 : index
    %c0_5 = arith.constant 0 : index
    %10 = vector.load %arg2[%c0_4, %c0_5] : memref<1x2048xf32, #tpu.memory_space<vmem>>, vector<1x2048xf32>
    tpu.vector_store %arg2[%c0_4, %c0_5], %9 {strides = array<i32>} : memref<1x2048xf32, #tpu.memory_space<vmem>>, vector<1x2048xf32>,
    return
  }
  func.func @transform_0(%arg0: i32) -> (i32, i32) {
    %c0_i32 = arith.constant 0 : i32
    %c0_i32_0 = arith.constant 0 : i32
    return %arg0, %c0_i32 : i32, i32
  }
  func.func @transform_1(%arg0: i32) -> (i32, i32) {
    %c0_i32 = arith.constant 0 : i32
    %c0_i32_0 = arith.constant 0 : i32
    return %arg0, %c0_i32 : i32, i32
  }
}

</mosaic_0001>

<bundles_post_ra>
// kernel: tpu_custom_call.1
= control target key start
LH: loop header
LB: loop body
LE: loop exit
PB: predicated region body
PF: predicated region fallthrough
CT: control target
= control target key end

     0   :  { %6 = vsyncpa [#allocation3], 0  ;;  %s136_s0 = inlined_call_operand.hbm [shape: f32[1,2048], index: 0, kind: input, shape index: {}]   ;;  %s137_s1 = inlined_call_operand.hbm [shape: f32[1,2048], index: 1, kind: output, shape index: {}]  }
   0x1   :  { %7 = vsyncpa [#allocation4], 0  ;;  %s100_s6 = smov [#allocation2]   ;;  %s52_s10 = scalar_lea.hbm %s136_s0, 256 }
   0x2   :  { %s14_s7 = sshll.u32 %s100_s6, 4  ;;  %p53_p0 = scmp.ne.s32.totalorder %s136_s0, %s52_s10  ;;  %s15_s7 = int_to_ptr.vmem [resolvable:$true] %s14_s7 }
   0x3   :  { %p56_p1 = scmp.lt.u32.totalorder %s52_s10, %s136_s0 }
   0x5   :  { %p58_p2 = pnand %p56_p1, %p53_p0 }
   0x7   :  { %61 = shalt.err (!%p58_p2)
}
   0x8   :  { %s62_s15 = scalar_lea.vmem %s15_s7, 256  ;;  %p67_p4 = scmp.lt.s32.totalorder %s15_s7, %s15_s7 }
   0x9   :  { %p63_p3 = scmp.ne.s32.totalorder %s15_s7, %s62_s15  ;;  %p68_p5 = scmp.lt.s32.totalorder %s62_s15, %s62_s15 }
   0xb   :  { %p69_p6 = por %p68_p5, %p67_p4 }
   0xd   :  { %p70_p7 = pnand %p69_p6, %p63_p3 }
   0xf   :  { %73 = shalt.err (!%p70_p7)
}
  0x10   :  { %17 = dma.hbm_to_vmem [thread:$0]  %s136_s0, 256, %s15_s7, [#allocation3]  }
  0x11   :  { %96 = dma.done.wait [#allocation3], 256  }
  0x12   :  { %97 = vsyncadd [#allocation3], 4294967040  ;;  %v21_v0 = vld [vmem:[#allocation2] sm:$0xff]  ;;  %v22_v1 = vld [vmem:[#allocation2 + $0x8] sm:$0xff]  ;;  %s101_s18 = smov [#allocation5]  }
  0x13   :  { %v23_v2 = vadd.f32 3.0, %v21_v0  ;;  %v24_v3 = vadd.f32 3.0, %v22_v1  ;;  %s41_s19 = sshll.u32 %s101_s18, 4  ;;  %s42_s19 = int_to_ptr.vmem [resolvable:$true] %s41_s19 }
  0x14   :  { %s74_s0 = scalar_lea.vmem %s42_s19, 256  ;;  %p79_p9 = scmp.lt.s32.totalorder %s42_s19, %s42_s19 }
  0x15   :  { %v25_v4 = vmax.f32 %v23_v2, 0.0  ;;  %v26_v5 = vmax.f32 %v24_v3, 0.0  ;;  %p75_p8 = scmp.ne.s32.totalorder %s42_s19, %s74_s0  ;;  %p80_p10 = scmp.lt.s32.totalorder %s74_s0, %s74_s0 }
  0x17   :  { %v27_v6 = vmin.f32 %v25_v4, 6.0  ;;  %v28_v7 = vmin.f32 %v26_v5, 6.0  ;;  %p81_p11 = por %p80_p10, %p79_p9 }
  0x19   :  { %v29_v8 = vmul.f32 %v27_v6, %v21_v0  ;;  %v30_v9 = vmul.f32 %v28_v7, %v22_v1  ;;  %p82_p12 = pnand %p81_p11, %p75_p8 }
  0x1b   :  { %v31_v10 = vmul.f32 0.16666667, %v29_v8  ;;  %v32_v11 = vmul.f32 0.16666667, %v30_v9 }
  0x1d   :  { %33 = vst [vmem:[#allocation5] sm:$0xff] %v31_v10  ;;  %34 = vst [vmem:[#allocation5 + $0x8] sm:$0xff] %v32_v11 }
  0x1e   :  { %85 = shalt.err (!%p82_p12)
}
  0x1f   :  { %s86_s22 = scalar_lea.hbm %s137_s1, 256 }
  0x20   :  { %p87_p13 = scmp.ne.s32.totalorder %s137_s1, %s86_s22  ;;  %p90_p0 = scmp.lt.u32.totalorder %s86_s22, %s137_s1 }
  0x22   :  { %p92_p1 = pnand %p90_p0, %p87_p13 }
  0x24   :  { %95 = shalt.err (!%p92_p1)
}
  0x25   :  { %44 = dma.vmem_to_hbm [thread:$0]  %s42_s19, 256, %s137_s1, [#allocation4]  }
  0x26   :  { %98 = dma.done.wait [#allocation4], 256  }
  0x27   :  { %99 = vsyncadd [#allocation4], 4294967040 }
  0x28   :  { %48 = vsyncpa [#allocation3], 1 }
  0x29   :  { %49 = vsyncpa [#allocation4], 1 }

</bundles_post_ra>
